<compile_context>
chip_gen: v5e
topology: v5e:2x2
jax: 0.10.0
libtpu: 0.0.40
codegen_flags: <defaults>
</compile_context>

<pallas_src>
import functools

import jax
import jax.numpy as jnp
import numpy as np
from jax.experimental import pallas as pl
from jax.experimental.pallas import tpu as pltpu


# --------------------------------------------------------------------------
# Pre-normalization pass: one O(M*D) sweep, emits bf16 row/column operands.
# --------------------------------------------------------------------------
def _normalize_kernel(x_ref, row_ref, col_ref, *, inv_temp):
    x = x_ref[...].astype(jnp.float32)                                # (tb, D)
    inv = jax.lax.rsqrt(
        jnp.maximum(jnp.sum(x * x, axis=-1, keepdims=True), jnp.float32(1e-16)))
    xn = x * inv                                                      # unit rows
    col_ref[...] = xn.astype(col_ref.dtype)
    row_ref[...] = (xn * jnp.float32(inv_temp)).astype(row_ref.dtype)


def _prenormalize(p1, inv_temp, tb):
    M, D = p1.shape
    return pl.pallas_call(
        functools.partial(_normalize_kernel, inv_temp=inv_temp),
        out_shape=(jax.ShapeDtypeStruct((M, D), jnp.bfloat16),   # p_row (x 1/T)
                   jax.ShapeDtypeStruct((M, D), jnp.bfloat16)),  # p_col
        grid_spec=pltpu.PrefetchScalarGridSpec(
            num_scalar_prefetch=0,
            grid=(M // tb,),
            in_specs=[pl.BlockSpec((tb, D), lambda i: (i, 0))],
            out_specs=[pl.BlockSpec((tb, D), lambda i: (i, 0)),
                       pl.BlockSpec((tb, D), lambda i: (i, 0))],
        ),
        compiler_params=pltpu.CompilerParams(
            dimension_semantics=("parallel",)),
    )(p1)


# --------------------------------------------------------------------------
# Main flash-style NT-Xent kernel.
#   grid = (M//tm, M//tn): row axis "parallel" (megacore), column axis
#   "arbitrary" (reduction, innermost).  (tm, 1) scratch accumulators.
# --------------------------------------------------------------------------
def _nt_xent_kernel(xr_ref, xc_ref, xp_ref, out_ref, m_scr, l_scr,
                    *, inv_temp, use_static_max):
    i = pl.program_id(0)          # row-tile index
    j = pl.program_id(1)          # col-tile index (reduction axis)
    tm = xr_ref.shape[0]
    tn = xc_ref.shape[0]

    # Similarity tile on the MXU: bf16 operands, f32 accumulation.  The row
    # operand already carries the 1/temperature factor, so sim == logits.
    sim = jax.lax.dot_general(xr_ref[...], xc_ref[...],
                              (((1,), (1,)), ((), ())),
                              preferred_element_type=jnp.float32)     # (tm, tn)

    # Does this (row-tile, col-tile) pair contain any diagonal element?
    overlap = jnp.logical_and(i * tm < (j + 1) * tn, j * tn < (i + 1) * tm)

    if use_static_max:
        # Static upper bound m = 1/temperature (cos-sim <= 1): no per-step
        # tile-max, no alpha exp, no rescale.
        @pl.when(j == 0)
        def _():
            l_scr[...] = jnp.zeros_like(l_scr)

        p = jnp.exp(sim - jnp.float32(inv_temp))                      # (tm, tn)
        l_scr[...] += jnp.sum(p, axis=-1, keepdims=True)

        # Remove the self-similarity (diagonal) contribution only on the one
        # column tile that actually intersects the diagonal.
        @pl.when(overlap)
        def _():
            col_g = jax.lax.broadcasted_iota(jnp.int32, (tm, tn), 1) + j * tn
            row_g = jax.lax.broadcasted_iota(jnp.int32, (tm, 1), 0) + i * tm
            diag = jnp.sum(jnp.where(col_g == row_g, p, jnp.float32(0.0)),
                           axis=-1, keepdims=True)
            l_scr[...] -= diag
    else:
        # Fallback: online (flash-style) logsumexp for very small temperatures.
        @pl.when(j == 0)
        def _():
            m_scr[...] = jnp.full_like(m_scr, -jnp.inf)
            l_scr[...] = jnp.zeros_like(l_scr)

        col_g = jax.lax.broadcasted_iota(jnp.int32, (tm, tn), 1) + j * tn
        row_g = jax.lax.broadcasted_iota(jnp.int32, (tm, 1), 0) + i * tm
        sim = jnp.where(col_g == row_g, jnp.float32(-1e30), sim)

        m_prev = m_scr[...]
        m_new = jnp.maximum(m_prev, jnp.max(sim, axis=-1, keepdims=True))
        alpha = jnp.exp(m_prev - m_new)
        l_scr[...] = alpha * l_scr[...] + jnp.sum(jnp.exp(sim - m_new),
                                                  axis=-1, keepdims=True)
        m_scr[...] = m_new

    @pl.when(j == pl.num_programs(1) - 1)
    def _():
        # Positive logit: rowwise dot of the (1/T-scaled) row block with the
        # unit-normalized partner block (fetched via the BlockSpec index_map).
        xr32 = xr_ref[...].astype(jnp.float32)
        xp32 = xp_ref[...].astype(jnp.float32)
        pos = jnp.sum(xr32 * xp32, axis=-1, keepdims=True)            # (tm, 1)
        if use_static_max:
            lse = jnp.float32(inv_temp) + jnp.log(l_scr[...])
        else:
            lse = m_scr[...] + jnp.log(l_scr[...])
        out_ref[...] = lse - pos


def _largest_tile(n, cap, prefer=128):
    """Largest divisor of n that is <= cap, preferring multiples of `prefer`
    (MXU-friendly), falling back to multiples of 8 (sublane alignment)."""
    # TODO(synk): for awkward M/N this can still return a degenerate small
    # tile (e.g. 8); padding M to a 128-multiple would be better for perf.
    for step in (prefer, 8):
        best = 0
        for cand in range(step, min(cap, n) + 1, step):
            if n % cand == 0:
                best = cand
        if best:
            return best
    return 0


def nt_xent_loss(p1, temperature, *, tm=None, tn=None):
    """p1: (2*batch_size, feature_dim). Returns scalar f32 NT-Xent loss."""
    M, D = p1.shape
    if M % 2 != 0:
        raise ValueError("p1 must have an even number of rows (2*batch_size).")
    N = M // 2
    if N % 8 != 0:
        # Sublane (8) alignment of the row tile; partner rows must form an
        # aligned contiguous block.
        raise ValueError("batch_size must be a multiple of 8 for this kernel.")
    inv_temp = 1.0 / float(temperature)

    # Tile sizes: row cap 256 (tm | N -> M//tm >= 2, both v7x TCs get work),
    # col cap 1024.  With bf16 inputs the per-step working set stays a few MiB
    # even at large D, well inside v7x's 64 MiB physical VMEM.
    if tm is None:
        tm = _largest_tile(N, 256)
    if tn is None:
        tn = _largest_tile(M, 1024)
    if tm == 0 or tn == 0 or N % tm != 0 or M % tn != 0:
        raise ValueError(f"Could not pick valid tiles for M={M}, N={N}.")

    # Pre-normalize once (bf16 outputs, 1/temperature folded into the row
    # operand).  Removes all per-step normalization from the hot loop and
    # halves the dominant column-block HBM->VMEM traffic.
    tb = _largest_tile(M, 256)
    p_row, p_col = _prenormalize(p1, inv_temp, tb)

    # Static-max path is numerically safe for typical SimCLR temperatures;
    # keep the online-max path for pathologically small temperatures.
    use_static_max = float(temperature) >= 0.05

    n_row_blocks = M // tm
    n_off = N // tm                      # partner block offset

    kernel = functools.partial(_nt_xent_kernel, inv_temp=inv_temp,
                               use_static_max=use_static_max)

    row_losses = pl.pallas_call(
        kernel,
        out_shape=jax.ShapeDtypeStruct((M, 1), jnp.float32),
        grid_spec=pltpu.PrefetchScalarGridSpec(
            num_scalar_prefetch=0,
            grid=(M // tm, M // tn),
            in_specs=[
                # row block (1/temperature already folded in)
                pl.BlockSpec((tm, D), lambda i, j: (i, 0)),
                # column block (reduction axis)
                pl.BlockSpec((tn, D), lambda i, j: (j, 0)),
                # partner block: rows (i*tm + N) % M .. — contiguous, aligned
                pl.BlockSpec((tm, D),
                             lambda i, j: ((i + n_off) % n_row_blocks, 0)),
            ],
            out_specs=pl.BlockSpec((tm, 1), lambda i, j: (i, 0)),
            scratch_shapes=[pltpu.VMEM((tm, 1), jnp.float32),   # m (online path)
                            pltpu.VMEM((tm, 1), jnp.float32)],  # l (running sum)
        ),
        compiler_params=pltpu.CompilerParams(
            dimension_semantics=("parallel", "arbitrary"),
            vmem_limit_bytes=48 * 1024 * 1024,
        ),
    )(p_row, p_col, p_col)

    # CrossEntropy(reduction='sum') with label 0, divided by 2*batch_size.
    return jnp.sum(row_losses) / jnp.float32(M)


def _nt_xent_reference(p1, temperature):
    """Pure-JAX re-implementation of the PyTorch forward, for validation."""
    p1 = p1.astype(jnp.float32)
    M = p1.shape[0]
    N = M // 2
    norms = jnp.linalg.norm(p1, axis=-1, keepdims=True)
    denom = jnp.maximum(norms * norms.T, 1e-8)
    sim = jnp.dot(p1, p1.T, precision=jax.lax.Precision.HIGHEST) / denom / temperature
    sim_i_j = jnp.diagonal(sim, offset=N)
    sim_j_i = jnp.diagonal(sim, offset=-N)
    positive = jnp.concatenate([sim_i_j, sim_j_i]).reshape(M, 1)

    mask = jnp.ones((M, M), dtype=bool)
    mask = mask.at[jnp.arange(M), jnp.arange(M)].set(False)
    idx = jnp.arange(N)
    mask = mask.at[idx, N + idx].set(False)
    mask = mask.at[N + idx, idx].set(False)
    negative = sim[mask].reshape(M, -1)

    logits = jnp.concatenate([positive, negative], axis=1)
    logp = jax.nn.log_softmax(logits, axis=-1)
    loss = -jnp.sum(logp[:, 0])
    return loss / M


if __name__ == "__main__":
    batch_size = 8          # module __init__ arg; forward sees 2*batch_size rows
    temperature = 0.5
    feature_dim = 128

    key = jax.random.PRNGKey(0)
    p1 = jax.random.normal(key, (2 * batch_size, feature_dim), dtype=jnp.float32)

    loss = nt_xent_loss(p1, temperature)
    loss = jax.block_until_ready(loss)

    ref = _nt_xent_reference(p1, temperature)
    # bf16 MXU operands -> tolerance relaxed vs. the pure-f32 variant.
    np.testing.assert_allclose(np.asarray(loss), np.asarray(ref),
                               rtol=5e-3, atol=5e-3)

    print("KERNEL_OK")
</pallas_src>

<mosaic_0001>
module attributes {stable_mosaic.version = 11 : i64} {
  func.func @_normalize_kernel(%arg0: i32, %arg1: memref<16x128xf32, #tpu.memory_space<vmem>>, %arg2: memref<16x128xbf16, #tpu.memory_space<vmem>>, %arg3: memref<16x128xbf16, #tpu.memory_space<vmem>>) attributes {dimension_semantics = [#tpu.dimension_semantics<parallel>], iteration_bounds = array<i64: 1>, scalar_prefetch = 0 : i64, scratch_operands = 0 : i64, tpu.core_type = #tpu.core_type<tc>, window_params = [{transform_indices = @transform_0, window_bounds = array<i64: 16, 128>}, {transform_indices = @transform_1, window_bounds = array<i64: 16, 128>}, {transform_indices = @transform_2, window_bounds = array<i64: 16, 128>}]} {
    %c0 = arith.constant 0 : index
    %c0_0 = arith.constant 0 : index
    %0 = vector.load %arg1[%c0, %c0_0] : memref<16x128xf32, #tpu.memory_space<vmem>>, vector<16x128xf32>
    %1 = arith.mulf %0, %0 : vector<16x128xf32>
    %cst = arith.constant dense<0.000000e+00> : vector<16xf32>
    %2 = vector.multi_reduction <add>, %1, %cst [1] : vector<16x128xf32> to vector<16xf32>
    %3 = vector.shape_cast %2 : vector<16xf32> to vector<16x1xf32>
    %cst_1 = arith.constant 1.000000e-16 : f32
    %4 = vector.broadcast %cst_1 : f32 to vector<16x1xf32>
    %5 = arith.maximumf %3, %4 : vector<16x1xf32>
    %6 = math.rsqrt %5 : vector<16x1xf32>
    %7 = vector.broadcast %6 : vector<16x1xf32> to vector<16x128xf32>
    %8 = arith.mulf %0, %7 : vector<16x128xf32>
    %9 = arith.truncf %8 : vector<16x128xf32> to vector<16x128xbf16>
    %c0_2 = arith.constant 0 : index
    %c0_3 = arith.constant 0 : index
    %10 = vector.load %arg3[%c0_2, %c0_3] : memref<16x128xbf16, #tpu.memory_space<vmem>>, vector<16x128xbf16>
    tpu.vector_store %arg3[%c0_2, %c0_3], %9 {strides = array<i32>} : memref<16x128xbf16, #tpu.memory_space<vmem>>, vector<16x128xbf16>,
    %cst_4 = arith.constant 2.000000e+00 : f32
    %11 = vector.broadcast %cst_4 : f32 to vector<16x128xf32>
    %12 = arith.mulf %8, %11 : vector<16x128xf32>
    %13 = arith.truncf %12 : vector<16x128xf32> to vector<16x128xbf16>
    %c0_5 = arith.constant 0 : index
    %c0_6 = arith.constant 0 : index
    %14 = vector.load %arg2[%c0_5, %c0_6] : memref<16x128xbf16, #tpu.memory_space<vmem>>, vector<16x128xbf16>
    tpu.vector_store %arg2[%c0_5, %c0_6], %13 {strides = array<i32>} : memref<16x128xbf16, #tpu.memory_space<vmem>>, vector<16x128xbf16>,
    return
  }
  func.func @transform_0(%arg0: i32) -> (i32, i32) {
    %c0_i32 = arith.constant 0 : i32
    %c0_i32_0 = arith.constant 0 : i32
    return %arg0, %c0_i32 : i32, i32
  }
  func.func @transform_1(%arg0: i32) -> (i32, i32) {
    %c0_i32 = arith.constant 0 : i32
    %c0_i32_0 = arith.constant 0 : i32
    return %arg0, %c0_i32 : i32, i32
  }
  func.func @transform_2(%arg0: i32) -> (i32, i32) {
    %c0_i32 = arith.constant 0 : i32
    %c0_i32_0 = arith.constant 0 : i32
    return %arg0, %c0_i32 : i32, i32
  }
}

</mosaic_0001>

<bundles_post_ra>
// kernel: tpu_custom_call.1
= control target key start
LH: loop header
LB: loop body
LE: loop exit
PB: predicated region body
PF: predicated region fallthrough
CT: control target
= control target key end

     0   :  { %8 = vsyncpa [#allocation3], 0  ;;  %s237_s0 = inlined_call_operand.hbm [shape: f32[16,128], index: 0, kind: input, shape index: {}]   ;;  %s238_s1 = inlined_call_operand.hbm [shape: bf16[16,128], index: 1, kind: output, shape index: {0}]   ;;  %s239_s2 = inlined_call_operand.hbm [shape: bf16[16,128], index: 2, kind: output, shape index: {1}]  }
   0x1   :  { %9 = vsyncpa [#allocation4], 0 }
   0x2   :  { %10 = vsyncpa [#allocation7], 0  ;;  %s15_s11 = sshll.u32 %s237_s0, 4  ;;  %s206_s12 = smov [#allocation2]   ;;  %s16_s11 = int_to_ptr.hbm [resolvable:$true] %s15_s11 }
   0x3   :  { %s17_s13 = sshll.u32 %s206_s12, 4  ;;  %s207_s14 = smov 128   ;;  %s18_s13 = int_to_ptr.vmem [resolvable:$true] %s17_s13 }
   0x4   :  { %s208_s15 = smov 8  }
   0x5   :  { %23 = dma.hbm_to_vmem [thread:$0]  %s16_s11, 256, %s18_s13, [#allocation3], %s207_s14, %s207_s14, %s208_s15  }
   0x6   :  { %200 = dma.done.wait [#allocation3], 256  }
   0x7   :  { %201 = vsyncadd [#allocation3], 4294967040  ;;  %v28_v0 = vld [vmem:[#allocation2] sm:$0xff]  ;;  %v29_v2 = vld [vmem:[#allocation2 + $0x8] sm:$0xff]  ;;  %s209_s0 = smov [#allocation6]   ;;  %s89_s19 = sshll.u32 %s239_s2, 4  ;;  %s90_s19 = int_to_ptr.hbm [resolvable:$true] %s89_s19 }
   0x8   :  { %v30_v1 = vmul.f32 %v28_v0, %v28_v0  ;;  %v31_v3 = vmul.f32 %v29_v2, %v29_v2  ;;  %s87_s16 = sshll.u32 %s209_s0, 4  ;;  %s210_s20 = smov [#allocation5]   ;;  %s88_s16 = int_to_ptr.vmem [resolvable:$true] %s87_s16 }
   0x9   :  { %s74_s21 = sshll.u32 %s210_s20, 4  ;;  %s76_s24 = sshll.u32 %s238_s1, 4  ;;  %s75_s21 = int_to_ptr.vmem [resolvable:$true] %s74_s21  ;;  %s77_s24 = int_to_ptr.hbm [resolvable:$true] %s76_s24 }
   0xa   :  { %32 = vadd.xlane.f32.xlu0 %v30_v1  ;;  %s211_s25 = smov 64   ;;  %s212_s26 = smov 4  }
  0x12   :  { %34 = vadd.xlane.f32.xlu0 %v31_v3 }
  0x7d   :  { %v33_v4 = vpop.xlane.xlu0 %32 }
  0x7e   :  { %v36_v5 = vmax.f32 %v33_v4, 1e-16 }
  0x80   :  { %124 = vrsqrt.f32 %v36_v5  ;;  %vm44_vm1 = vweird.f32 %v36_v5 }
  0x85   :  { %v35_v6 = vpop.xlane.xlu0 %34 }
  0x86   :  { %v125_v7 = vpop.eup %124  ;;  %v37_v8 = vmax.f32 %v35_v6, 1e-16 }
  0x87   :  { %v39_v9 = vmul.f32 %v125_v7, %v36_v5  ;;  %vm45_vm0 = vweird.f32 %v125_v7 }
  0x88   :  { %126 = vrsqrt.f32 %v37_v8  ;;  %vm46_vm2 = vmor %vm44_vm1, %vm45_vm0  ;;  %vm54_vm4 = vweird.f32 %v37_v8 }
  0x89   :  { %v40_v10 = vmul.f32 %v125_v7, %v39_v9 }
  0x8b   :  { %v41_v11 = vmul.f32 0.5, %v40_v10 }
  0x8d   :  { %v42_v12 = vsub.f32 1.5, %v41_v11 }
  0x8e   :  { %v127_v13 = vpop.eup %126 }
  0x8f   :  { %v49_v14 = vmul.f32 %v127_v13, %v37_v8  ;;  %v43_v15 = vmul.f32 %v125_v7, %v42_v12  ;;  %vm55_vm3 = vweird.f32 %v127_v13 }
  0x90   :  { %vm56_vm5 = vmor %vm54_vm4, %vm55_vm3 }
  0x91   :  { %v50_v16 = vmul.f32 %v127_v13, %v49_v14  ;;  %v47_v18 = vsel %vm46_vm2, %v125_v7, %v43_v15 }
  0x92   :  { %v58_v21 = vmul.f32 %v47_v18, %v28_v0 }
  0x93   :  { %v51_v17 = vmul.f32 0.5, %v50_v16 }
  0x94   :  { %v64_v24 = vmul.f32 2.0, %v58_v21 }
  0x95   :  { %v52_v19 = vsub.f32 1.5, %v51_v17 }
  0x97   :  { %v53_v20 = vmul.f32 %v127_v13, %v52_v19 }
  0x99   :  { %v57_v22 = vsel %vm56_vm5, %v127_v13, %v53_v20 }
  0x9a   :  { %v59_v23 = vmul.f32 %v57_v22, %v29_v2 }
  0x9c   :  { %v65_v25 = vmul.f32 2.0, %v59_v23  ;;  %v110_v26 = vpack.c.bf16 %v59_v23, %v58_v21 }
  0x9e   :  { %v115_v27 = vpack.c.bf16 %v65_v25, %v64_v24  ;;  %111 = vst [vmem:[#allocation6] sm:$0xff] %v110_v26  }
  0x9f   :  { %95 = dma.vmem_to_hbm [thread:$0]  %s88_s16, 128, %s90_s19, [#allocation7], %s211_s25, %s211_s25, %s212_s26  }
  0xa0   :  { %116 = vst [vmem:[#allocation5] sm:$0xff] %v115_v27  }
  0xa1   :  { %82 = dma.vmem_to_hbm [thread:$0]  %s75_s21, 128, %s77_s24, [#allocation4], %s211_s25, %s211_s25, %s212_s26  }
  0xa2   :  { %202 = dma.done.wait [#allocation4], 128  }
  0xa3   :  { %203 = vsyncadd [#allocation4], 4294967168 }
  0xa4   :  { %204 = dma.done.wait [#allocation7], 128  }
  0xa5   :  { %205 = vsyncadd [#allocation7], 4294967168 }
  0xa6   :  { %104 = vsyncpa [#allocation3], 1 }
  0xa7   :  { %105 = vsyncpa [#allocation4], 1 }
  0xa8   :  { %106 = vsyncpa [#allocation7], 1 }

</bundles_post_ra>
